<compile_context>
chip_gen: v6e
topology: v6e:2x2x1
jax: 0.10.0
libtpu: 0.0.40
codegen_flags: <defaults>
</compile_context>

<pallas_src>
import math

import jax
import jax.numpy as jnp
from jax import lax
from jax.experimental import pallas as pl
from jax.experimental.pallas import tpu as pltpu


# ---------------------------------------------------------------------------
# Kernel
# ---------------------------------------------------------------------------
def adain_linear_kernel(x_ref, z_ref, w1_ref, b1_ref, w2_ref, b2_ref, o_ref):
    # Per-grid-step tiles: x_ref (BB, N, Cp), z_ref (BB, M, Cp), weights full.
    x = x_ref[...].astype(jnp.float32)          # [BB, N, Cp]
    z = z_ref[...].astype(jnp.float32)          # [BB, M, Cp]
    bb, n, cp = x.shape
    m = z.shape[1]

    # torch.std_mean(dim=1, keepdim=True): mean + *unbiased* std over seq dim.
    mean_x = jnp.mean(x, axis=1, keepdims=True)                       # [BB,1,Cp]
    std_x = jnp.sqrt(jnp.sum((x - mean_x) ** 2, axis=1, keepdims=True)
                     / jnp.float32(n - 1))
    mean_z = jnp.mean(z, axis=1, keepdims=True)
    std_z = jnp.sqrt(jnp.sum((z - mean_z) ** 2, axis=1, keepdims=True)
                     / jnp.float32(m - 1))

    # AdaIn: std_z * (x - mean_x) / (std_x + 1e-10) + mean_z
    #      = x * scale + shift     (divide hoisted to a [BB,1,Cp] reciprocal)
    inv_std_x = pl.reciprocal(std_x + jnp.float32(1e-10), approx=True)  # EUP
    scale = std_z * inv_std_x                                          # [BB,1,Cp]
    shift = mean_z - mean_x * scale                                    # [BB,1,Cp]
    y = x * scale + shift                                              # [BB,N,Cp]

    # Flatten batch into the matmul M dim; feed the MXU bf16, accumulate f32.
    y2 = y.reshape(bb * n, cp).astype(jnp.bfloat16)                    # [BB*N,Cp]

    # Linear(out_channel -> hidden) + GELU (tanh approximation, EUP-native).
    h = jnp.dot(y2, w1_ref[...], preferred_element_type=jnp.float32) + b1_ref[...]
    h = jax.nn.gelu(h, approximate=True)

    # Linear(hidden -> out_channel)
    out = jnp.dot(h.astype(jnp.bfloat16), w2_ref[...],
                  preferred_element_type=jnp.float32) + b2_ref[...]
    o_ref[...] = out.reshape(bb, n, cp).astype(o_ref.dtype)


# ---------------------------------------------------------------------------
# Wrapper
# ---------------------------------------------------------------------------
def _round_up(n, m):
    return ((n + m - 1) // m) * m


def _pad_last(a, new_last):
    pad = new_last - a.shape[-1]
    if pad == 0:
        return a
    widths = [(0, 0)] * (a.ndim - 1) + [(0, pad)]
    return jnp.pad(a, widths)


def _pad_2d(a, rows, cols):
    return jnp.pad(a, ((0, rows - a.shape[0]), (0, cols - a.shape[1])))


def _pick_batch_block(B, N, M, Cp, budget_bytes=16 * 1024 * 1024):
    """Largest divisor of B that (a) keeps >=2 grid steps (v7x megacore) and
    (b) keeps the per-step working set under a conservative VMEM budget."""
    if B <= 1:
        return 1
    # rough per-batch bytes: double-buffered x/z/out tiles + f32 temporaries
    per_batch = (2 * (2 * N + M) * Cp + 4 * N * Cp) * 4
    cap = max(1, budget_bytes // max(per_batch, 1))
    best = 1
    for d in range(1, B // 2 + 1):
        if B % d == 0 and d <= cap:
            best = d
    return best


def adain_linear(x, z, w1, b1, w2, b2, *, batch_block=None):
    B, N, C = x.shape
    Bz, M, Cz = z.shape
    assert Bz == B and Cz == C, "x and z must share batch and channel dims"
    H = w1.shape[1]
    if N < 2 or M < 2:
        # Unbiased std (ddof=1) over dim=1 divides by (len-1); PyTorch yields
        # NaN for length-1 sequences as well, so require len >= 2.
        raise ValueError("AdaIn unbiased std requires sequence length >= 2")

    # Lane-dense padding: make every last dim a multiple of 128 lanes.
    Cp = _round_up(C, 128)
    Hp = _round_up(H, 128)

    xp = _pad_last(x, Cp)                                   # (B, N, Cp)
    zp = _pad_last(z, Cp)                                   # (B, M, Cp)
    w1p = _pad_2d(w1, Cp, Hp).astype(jnp.bfloat16)          # (Cp, Hp)  MXU bf16
    w2p = _pad_2d(w2, Hp, Cp).astype(jnp.bfloat16)          # (Hp, Cp)
    b1p = _pad_last(b1.astype(jnp.float32), Hp)             # (1, Hp)
    b2p = _pad_last(b2.astype(jnp.float32), Cp)             # (1, Cp)

    BB = batch_block if batch_block is not None else _pick_batch_block(B, N, M, Cp)
    assert B % BB == 0
    grid = (B // BB,)

    # Advisory cost estimate so XLA overlaps surrounding HLO correctly.
    cost = pl.CostEstimate(
        flops=4 * B * N * Cp * Hp,                 # two matmuls (2 flops/MAC)
        transcendentals=B * N * Hp,                # tanh in GELU
        bytes_accessed=4 * (B * N * Cp * 2 + B * M * Cp + Hp + Cp)
        + 2 * (2 * Cp * Hp),
    )

    out_padded = pl.pallas_call(
        adain_linear_kernel,
        out_shape=jax.ShapeDtypeStruct((B, N, Cp), x.dtype),
        grid=grid,
        in_specs=[
            pl.BlockSpec((BB, N, Cp), lambda b: (b, 0, 0)),   # x batch block
            pl.BlockSpec((BB, M, Cp), lambda b: (b, 0, 0)),   # z batch block
            pl.BlockSpec((Cp, Hp), lambda b: (0, 0)),          # W1 (resident)
            pl.BlockSpec((1, Hp), lambda b: (0, 0)),           # b1
            pl.BlockSpec((Hp, Cp), lambda b: (0, 0)),          # W2 (resident)
            pl.BlockSpec((1, Cp), lambda b: (0, 0)),           # b2
        ],
        out_specs=pl.BlockSpec((BB, N, Cp), lambda b: (b, 0, 0)),
        compiler_params=pltpu.CompilerParams(
            dimension_semantics=("parallel",)),
        cost_estimate=cost,
    )(xp, zp, w1p, b1p, w2p, b2p)

    return out_padded[:, :, :C]


# ---------------------------------------------------------------------------
# Pure-JAX reference mirroring the PyTorch forward (exact erf GELU, f32).
# ---------------------------------------------------------------------------
def adain_linear_ref(x, z, w1, b1, w2, b2):
    mean_x = jnp.mean(x, axis=1, keepdims=True)
    std_x = jnp.std(x, axis=1, keepdims=True, ddof=1)
    mean_z = jnp.mean(z, axis=1, keepdims=True)
    std_z = jnp.std(z, axis=1, keepdims=True, ddof=1)
    y = std_z * (x - mean_x) / (std_x + 1e-10) + mean_z
    h = y @ w1 + b1
    h = 0.5 * h * (1.0 + lax.erf(h / jnp.sqrt(2.0)))
    return h @ w2 + b2


if __name__ == "__main__":
    # Small shapes consistent with the module: out_channel=4, hidden=32,
    # batch=2, seq=8 for both x and z.
    B, N, M, C, H = 2, 8, 8, 4, 32

    key = jax.random.PRNGKey(0)
    kx, kz, kw1, kb1, kw2, kb2 = jax.random.split(key, 6)

    x = jax.random.normal(kx, (B, N, C), dtype=jnp.float32)
    z = jax.random.normal(kz, (B, M, C), dtype=jnp.float32)

    # Deterministic parameter init (nn.Linear-style uniform bounds).
    bound1 = 1.0 / math.sqrt(C)
    w1 = jax.random.uniform(kw1, (C, H), jnp.float32, -bound1, bound1)
    b1 = jax.random.uniform(kb1, (1, H), jnp.float32, -bound1, bound1)
    bound2 = 1.0 / math.sqrt(H)
    w2 = jax.random.uniform(kw2, (H, C), jnp.float32, -bound2, bound2)
    b2 = jax.random.uniform(kb2, (1, C), jnp.float32, -bound2, bound2)

    out = adain_linear(x, z, w1, b1, w2, b2)
    out = jax.block_until_ready(out)

    ref = adain_linear_ref(x, z, w1, b1, w2, b2)
    assert out.shape == (B, N, C)

    # Kernel uses bf16 MXU operands, tanh-GELU and an approximate EUP
    # reciprocal, so compare against the exact-erf f32 reference with a
    # correspondingly loose (but still tight in absolute terms) tolerance.
    max_diff = float(jnp.max(jnp.abs(out - ref)))
    assert max_diff < 5e-2, f"max abs diff {max_diff}"

    print("KERNEL_OK")
</pallas_src>

<mosaic_0001>
module attributes {stable_mosaic.version = 11 : i64} {
  func.func @adain_linear_kernel(%arg0: i32, %arg1: memref<1x8x128xf32, #tpu.memory_space<vmem>>, %arg2: memref<1x8x128xf32, #tpu.memory_space<vmem>>, %arg3: memref<128x128xbf16, #tpu.memory_space<vmem>>, %arg4: memref<1x128xf32, #tpu.memory_space<vmem>>, %arg5: memref<128x128xbf16, #tpu.memory_space<vmem>>, %arg6: memref<1x128xf32, #tpu.memory_space<vmem>>, %arg7: memref<1x8x128xf32, #tpu.memory_space<vmem>>) attributes {dimension_semantics = [#tpu.dimension_semantics<parallel>], iteration_bounds = array<i64: 2>, scalar_prefetch = 0 : i64, scratch_operands = 0 : i64, tpu.core_type = #tpu.core_type<tc>, window_params = [{transform_indices = @transform_0, window_bounds = array<i64: 1, 8, 128>}, {transform_indices = @transform_1, window_bounds = array<i64: 1, 8, 128>}, {pipeline_mode = #tpu.pipeline_mode<synchronous>, transform_indices = @transform_2, window_bounds = array<i64: 128, 128>}, {pipeline_mode = #tpu.pipeline_mode<synchronous>, transform_indices = @transform_3, window_bounds = array<i64: 1, 128>}, {pipeline_mode = #tpu.pipeline_mode<synchronous>, transform_indices = @transform_4, window_bounds = array<i64: 128, 128>}, {pipeline_mode = #tpu.pipeline_mode<synchronous>, transform_indices = @transform_5, window_bounds = array<i64: 1, 128>}, {transform_indices = @transform_6, window_bounds = array<i64: 1, 8, 128>}]} {
    %c0 = arith.constant 0 : index
    %c0_0 = arith.constant 0 : index
    %c0_1 = arith.constant 0 : index
    %0 = vector.load %arg1[%c0, %c0_0, %c0_1] : memref<1x8x128xf32, #tpu.memory_space<vmem>>, vector<1x8x128xf32>
    %c0_2 = arith.constant 0 : index
    %c0_3 = arith.constant 0 : index
    %c0_4 = arith.constant 0 : index
    %1 = vector.load %arg2[%c0_2, %c0_3, %c0_4] : memref<1x8x128xf32, #tpu.memory_space<vmem>>, vector<1x8x128xf32>
    %cst = arith.constant dense<0.000000e+00> : vector<1x128xf32>
    %2 = vector.multi_reduction <add>, %0, %cst [1] : vector<1x8x128xf32> to vector<1x128xf32>
    %3 = vector.shape_cast %2 : vector<1x128xf32> to vector<1x1x128xf32>
    %cst_5 = arith.constant 8.000000e+00 : f32
    %4 = vector.broadcast %cst_5 : f32 to vector<1x1x128xf32>
    %5 = arith.divf %3, %4 : vector<1x1x128xf32>
    %6 = vector.broadcast %5 : vector<1x1x128xf32> to vector<1x8x128xf32>
    %7 = arith.subf %0, %6 : vector<1x8x128xf32>
    %8 = arith.mulf %7, %7 : vector<1x8x128xf32>
    %cst_6 = arith.constant dense<0.000000e+00> : vector<1x128xf32>
    %9 = vector.multi_reduction <add>, %8, %cst_6 [1] : vector<1x8x128xf32> to vector<1x128xf32>
    %10 = vector.shape_cast %9 : vector<1x128xf32> to vector<1x1x128xf32>
    %cst_7 = arith.constant 7.000000e+00 : f32
    %11 = vector.broadcast %cst_7 : f32 to vector<1x1x128xf32>
    %12 = arith.divf %10, %11 : vector<1x1x128xf32>
    %13 = math.sqrt %12 : vector<1x1x128xf32>
    %cst_8 = arith.constant dense<0.000000e+00> : vector<1x128xf32>
    %14 = vector.multi_reduction <add>, %1, %cst_8 [1] : vector<1x8x128xf32> to vector<1x128xf32>
    %15 = vector.shape_cast %14 : vector<1x128xf32> to vector<1x1x128xf32>
    %cst_9 = arith.constant 8.000000e+00 : f32
    %16 = vector.broadcast %cst_9 : f32 to vector<1x1x128xf32>
    %17 = arith.divf %15, %16 : vector<1x1x128xf32>
    %18 = vector.broadcast %17 : vector<1x1x128xf32> to vector<1x8x128xf32>
    %19 = arith.subf %1, %18 : vector<1x8x128xf32>
    %20 = arith.mulf %19, %19 : vector<1x8x128xf32>
    %cst_10 = arith.constant dense<0.000000e+00> : vector<1x128xf32>
    %21 = vector.multi_reduction <add>, %20, %cst_10 [1] : vector<1x8x128xf32> to vector<1x128xf32>
    %22 = vector.shape_cast %21 : vector<1x128xf32> to vector<1x1x128xf32>
    %cst_11 = arith.constant 7.000000e+00 : f32
    %23 = vector.broadcast %cst_11 : f32 to vector<1x1x128xf32>
    %24 = arith.divf %22, %23 : vector<1x1x128xf32>
    %25 = math.sqrt %24 : vector<1x1x128xf32>
    %cst_12 = arith.constant 1.000000e-10 : f32
    %26 = vector.broadcast %cst_12 : f32 to vector<1x1x128xf32>
    %27 = arith.addf %13, %26 : vector<1x1x128xf32>
    %28 = tpu.reciprocal %27 {approx = true} : vector<1x1x128xf32> -> vector<1x1x128xf32>
    %29 = arith.mulf %25, %28 : vector<1x1x128xf32>
    %30 = arith.mulf %5, %29 : vector<1x1x128xf32>
    %31 = arith.subf %17, %30 : vector<1x1x128xf32>
    %32 = vector.broadcast %29 : vector<1x1x128xf32> to vector<1x8x128xf32>
    %33 = arith.mulf %0, %32 : vector<1x8x128xf32>
    %34 = vector.broadcast %31 : vector<1x1x128xf32> to vector<1x8x128xf32>
    %35 = arith.addf %33, %34 : vector<1x8x128xf32>
    %36 = vector.shape_cast %35 : vector<1x8x128xf32> to vector<8x128xf32>
    %37 = arith.truncf %36 : vector<8x128xf32> to vector<8x128xbf16>
    %c0_13 = arith.constant 0 : index
    %c0_14 = arith.constant 0 : index
    %38 = vector.load %arg3[%c0_13, %c0_14] : memref<128x128xbf16, #tpu.memory_space<vmem>>, vector<128x128xbf16>
    %cst_15 = arith.constant dense<0.000000e+00> : vector<8x128xf32>
    %39 = tpu.matmul %37, %38, %cst_15 {dimension_numbers = #tpu.dot_dimension_numbers<[1], [0], [0], [1], [0, 0, 1, 1], [], []>} : vector<8x128xbf16>, vector<128x128xbf16>, vector<8x128xf32> -> vector<8x128xf32>
    %c0_16 = arith.constant 0 : index
    %c0_17 = arith.constant 0 : index
    %40 = vector.load %arg4[%c0_16, %c0_17] : memref<1x128xf32, #tpu.memory_space<vmem>>, vector<1x128xf32>
    %41 = vector.broadcast %40 : vector<1x128xf32> to vector<8x128xf32>
    %42 = arith.addf %39, %41 : vector<8x128xf32>
    %43 = arith.mulf %42, %42 : vector<8x128xf32>
    %44 = arith.mulf %42, %43 : vector<8x128xf32>
    %cst_18 = arith.constant 4.471500e-02 : f32
    %45 = vector.broadcast %cst_18 : f32 to vector<8x128xf32>
    %46 = arith.mulf %45, %44 : vector<8x128xf32>
    %47 = arith.addf %42, %46 : vector<8x128xf32>
    %cst_19 = arith.constant 0.797884583 : f32
    %48 = vector.broadcast %cst_19 : f32 to vector<8x128xf32>
    %49 = arith.mulf %48, %47 : vector<8x128xf32>
    %50 = math.tanh %49 : vector<8x128xf32>
    %cst_20 = arith.constant 1.000000e+00 : f32
    %51 = vector.broadcast %cst_20 : f32 to vector<8x128xf32>
    %52 = arith.addf %51, %50 : vector<8x128xf32>
    %cst_21 = arith.constant 5.000000e-01 : f32
    %53 = vector.broadcast %cst_21 : f32 to vector<8x128xf32>
    %54 = arith.mulf %53, %52 : vector<8x128xf32>
    %55 = arith.mulf %42, %54 : vector<8x128xf32>
    %56 = arith.truncf %55 : vector<8x128xf32> to vector<8x128xbf16>
    %c0_22 = arith.constant 0 : index
    %c0_23 = arith.constant 0 : index
    %57 = vector.load %arg5[%c0_22, %c0_23] : memref<128x128xbf16, #tpu.memory_space<vmem>>, vector<128x128xbf16>
    %cst_24 = arith.constant dense<0.000000e+00> : vector<8x128xf32>
    %58 = tpu.matmul %56, %57, %cst_24 {dimension_numbers = #tpu.dot_dimension_numbers<[1], [0], [0], [1], [0, 0, 1, 1], [], []>} : vector<8x128xbf16>, vector<128x128xbf16>, vector<8x128xf32> -> vector<8x128xf32>
    %c0_25 = arith.constant 0 : index
    %c0_26 = arith.constant 0 : index
    %59 = vector.load %arg6[%c0_25, %c0_26] : memref<1x128xf32, #tpu.memory_space<vmem>>, vector<1x128xf32>
    %60 = vector.broadcast %59 : vector<1x128xf32> to vector<8x128xf32>
    %61 = arith.addf %58, %60 : vector<8x128xf32>
    %62 = vector.shape_cast %61 : vector<8x128xf32> to vector<1x8x128xf32>
    %c0_27 = arith.constant 0 : index
    %c0_28 = arith.constant 0 : index
    %c0_29 = arith.constant 0 : index
    %63 = vector.load %arg7[%c0_27, %c0_28, %c0_29] : memref<1x8x128xf32, #tpu.memory_space<vmem>>, vector<1x8x128xf32>
    tpu.vector_store %arg7[%c0_27, %c0_28, %c0_29], %62 {strides = array<i32>} : memref<1x8x128xf32, #tpu.memory_space<vmem>>, vector<1x8x128xf32>,
    return
  }
  func.func @transform_0(%arg0: i32) -> (i32, i32, i32) {
    %c0_i32 = arith.constant 0 : i32
    %c0_i32_0 = arith.constant 0 : i32
    %c0_i32_1 = arith.constant 0 : i32
    return %arg0, %c0_i32, %c0_i32_0 : i32, i32, i32
  }
  func.func @transform_1(%arg0: i32) -> (i32, i32, i32) {
    %c0_i32 = arith.constant 0 : i32
    %c0_i32_0 = arith.constant 0 : i32
    %c0_i32_1 = arith.constant 0 : i32
    return %arg0, %c0_i32, %c0_i32_0 : i32, i32, i32
  }
  func.func @transform_2(%arg0: i32) -> (i32, i32) {
    %c0_i32 = arith.constant 0 : i32
    %c0_i32_0 = arith.constant 0 : i32
    %c0_i32_1 = arith.constant 0 : i32
    return %c0_i32, %c0_i32_0 : i32, i32
  }
  func.func @transform_3(%arg0: i32) -> (i32, i32) {
    %c0_i32 = arith.constant 0 : i32
    %c0_i32_0 = arith.constant 0 : i32
    %c0_i32_1 = arith.constant 0 : i32
    return %c0_i32, %c0_i32_0 : i32, i32
  }
  func.func @transform_4(%arg0: i32) -> (i32, i32) {
    %c0_i32 = arith.constant 0 : i32
    %c0_i32_0 = arith.constant 0 : i32
    %c0_i32_1 = arith.constant 0 : i32
    return %c0_i32, %c0_i32_0 : i32, i32
  }
  func.func @transform_5(%arg0: i32) -> (i32, i32) {
    %c0_i32 = arith.constant 0 : i32
    %c0_i32_0 = arith.constant 0 : i32
    %c0_i32_1 = arith.constant 0 : i32
    return %c0_i32, %c0_i32_0 : i32, i32
  }
  func.func @transform_6(%arg0: i32) -> (i32, i32, i32) {
    %c0_i32 = arith.constant 0 : i32
    %c0_i32_0 = arith.constant 0 : i32
    %c0_i32_1 = arith.constant 0 : i32
    return %arg0, %c0_i32, %c0_i32_0 : i32, i32, i32
  }
}

</mosaic_0001>

<bundles_post_ra>
// kernel: tpu_custom_call.1
= control target key start
LH: loop header
LB: loop body
LE: loop exit
PB: predicated region body
PF: predicated region fallthrough
CT: control target
= control target key end

     0   :  { %s1439_s0 = inlined_call_operand.hbm [shape: f32[2,8,128], index: 0, kind: input, shape index: {}]   ;;  %s1440_s1 = inlined_call_operand.hbm [shape: f32[2,8,128], index: 1, kind: input, shape index: {}]   ;;  %s1441_s2 = inlined_call_operand.hbm [shape: bf16[128,128], index: 2, kind: input, shape index: {}]   ;;  %s1442_s3 = inlined_call_operand.vmem [shape: f32[1,128], index: 3, kind: input, shape index: {}]   ;;  %s1443_s4 = inlined_call_operand.hbm [shape: bf16[128,128], index: 4, kind: input, shape index: {}]   ;;  %s1444_s5 = inlined_call_operand.vmem [shape: f32[1,128], index: 5, kind: input, shape index: {}]   ;;  %s1445_s6 = inlined_call_operand.hbm [shape: f32[2,8,128], index: 6, kind: output, shape index: {}]  }
   0x1   :  { %1450 = sst [smem:[#allocation17_spill]] %s1441_s2 }
   0x2   :  { %1451 = sst [smem:[#allocation18_spill]] %s1443_s4 }
   0x3   :  { %11 = vsyncpa [#allocation3], 0 }
   0x4   :  { %13 = vsyncpa [#allocation3 + $0x1], 0 }
   0x5   :  { %14 = vsyncpa [#allocation6], 0 }
   0x6   :  { %16 = vsyncpa [#allocation6 + $0x1], 0 }
   0x7   :  { %17 = vsyncpa [#allocation9], 0 }
   0x8   :  { %18 = vsyncpa [#allocation4], 0 }
   0x9   :  { %20 = vsyncpa [#allocation4 + $0x1], 0  ;;  %s1176_s21 = smov 0   ;;  %s1178_s22 = smov 0  }
   0xa   :  { %s1180_s23 = smov 0   ;;  %s1182_s24 = smov 0  }
   0xb LB: > { %s1197_s25 = sadd.s32 4294967295, %s1130_s24   ;;  %s751_s26 = sadd.s32 4294967294, %s1130_s24   ;;  %s1130_s24 = sphi %s1182_s24, %s1475_s24   ;;  %s1126_s23 = sphi %s1180_s23, %s1474_s23   ;;  %s1122_s22 = sphi %s1178_s22, %s1473_s22   ;;  %s1118_s21 = sphi %s1176_s21, %s1472_s21  }
   0xc   : > { %p46_p0 = scmp.ne.s32.totalorder %s1122_s22, %s1118_s21  ;;  %p1446_p1 = scmp.eq.s32.totalorder %s1197_s25, 0 }
   0xd   : > { %p186_p3 = scmp.eq.s32.totalorder %s751_s26, 1  ;;  %p752_p5 = scmp.ge.s32.totalorder %s1130_s24, 1 }
   0xe   : > { %p1206_p4 = por %p1446_p1, %p46_p0  ;;  %p193_p7 = scmp.lt.s32.totalorder %s1130_s24, 3 }
   0xf   : > { %p1211_p6 = por %p186_p3, %p46_p0  ;;  %s1132_s30 = smov [#allocation7]  }
  0x10   : > { %s1452_s27 = scalar_select %p1206_p4, 1, 0 }
  0x11   : > { %s1453_s28 = scalar_select %p1211_p6, 1, 0 }
  0x12   : > { %p1216_p8 = pnand %p752_p5, %p193_p7  ;;  %s205_s7 = sshll.u32 %s1132_s30, 4  ;;  %s206_s7 = int_to_ptr.vmem [resolvable:$true] %s205_s7 }
  0x13   : > { %s1133_s9 = smov [#allocation8]   ;;  %s957_s11 = scalar_lea.vmem %s206_s7, 1024 }
  0x14   : > { %s1454_s29 = scalar_select %p1216_p8, 1, 0 }
  0x15   : > { %p860_p9 = pneg %p1216_p8  ;;  %s221_s10 = sshll.u32 %s1133_s9, 4  ;;  %s222_s10 = int_to_ptr.vmem [resolvable:$true] %s221_s10 }
  0x16   : > { %p958_p13 = scmp.ne.s32.totalorder %s206_s7, %s957_s11  ;;  %p965_p5 = scmp.lt.s32.totalorder %s206_s7, %s206_s7 }
  0x17   : > { %p1225_p11 = pnand %p860_p9, %p1446_p1  ;;  %p966_p7 = scmp.lt.s32.totalorder %s957_s11, %s957_s11 }
  0x19   : > { %p948_p12 = pneg %p1225_p11  ;;  %p967_p10 = por %p966_p7, %p965_p5 }
  0x1b   : > { %p960_p0 = pnand %p958_p13, %p948_p12 }
  0x1d   : > { %p961_p3 = pneg %p960_p0 }
  0x1f   : > { %p968_p9 = pnand %p967_p10, %p961_p3 }
  0x21   : > { %971 = shalt.err (!%p968_p9)
}
  0x22   : > { %s1134_s12 = smov 64   ;;  %s1135_s13 = smov 4  }
  0x23   : > { %s1456_s2 = sld [smem:[#allocation17_spill]]  ;;  %s983_s16 = scalar_lea.vmem %s222_s10, 1024 }
  0x24   : > { %p984_p1 = scmp.ne.s32.totalorder %s222_s10, %s983_s16  ;;  %p991_p2 = scmp.lt.s32.totalorder %s222_s10, %s222_s10 }
  0x25   : > { %p992_p6 = scmp.lt.s32.totalorder %s983_s16, %s983_s16 }
  0x26   : > { %p986_p13 = pnand %p984_p1, %p948_p12 }
  0x27   : > { %p993_p5 = por %p992_p6, %p991_p2 }
  0x28   : > { %p987_p0 = pneg %p986_p13 }
  0x29   : > { %863 = dma.hbm_to_vmem [thread:$0]  (!%p1225_p11), %s1456_s2, 1024, %s206_s7, [#allocation6], %s1134_s12, %s1134_s12, %s1135_s13  }
  0x2a   : > { %p994_p10 = pnand %p993_p5, %p987_p0 }
  0x2c   : > { %997 = shalt.err (!%p994_p10)
}
  0x2d   : > { %s1457_s4 = sld [smem:[#allocation18_spill]]  ;;  %s1248_s19 = sadd.s32 1, %s1130_s24  }
  0x2e   : > { %s33_s20 = sadd.s32 1, %s1126_s23  ;;  %s30_s26 = ssub.s32 %s1130_s24, %s1248_s19 }
  0x2f   : > { %p40_p1 = scmp.ne.s32.totalorder %s1126_s23, %s1122_s22  ;;  %p31_p2 = scmp.eq.s32.totalorder %s30_s26, 0 }
  0x30   : > { %p41_p6 = scmp.eq.s32.totalorder %s1130_s24, 0  ;;  %p1458_p12 = scmp.eq.s32.totalorder %s1197_s25, 1 }
  0x31   : > { %p880_p7 = scmp.lt.s32.totalorder %s1130_s24, 2  ;;  %s238_s8 = sand.u32 1, %s1126_s23  }
  0x32   : > { %p1258_p3 = por %p1458_p12, %p40_p1  ;;  %p42_p9 = por %p41_p6, %p40_p1 }
  0x33   : > { %866 = dma.hbm_to_vmem [thread:$0]  (!%p1225_p11), %s1457_s4, 1024, %s222_s10, [#allocation9], %s1134_s12, %s1134_s12, %s1135_s13  }
  0x34   : > { %s1459_s30 = scalar_select %p1258_p3, 1, 0 }
  0x35   : > { %s1264_s7 = scalar_select %p31_p2, %s1126_s23, %s33_s20  }
  0x36   : > { %s1267_s9 = sshll.u32 %s238_s8, 3  ;;  %s757_s10 = sshll.u32 %s1130_s24, 7 }
  0x37   : > { %1460 = sst [smem:[#allocation16_spill]] %s1264_s7  ;;  %s1273_s13 = scalar_lea.hbm %s1439_s0, %s757_s10 }
  0x38   : > { %s242_s14 = scalar_lea.vmem [#allocation2], %s1267_s9  ;;  %p1278_p11 = pnand %p880_p7, %p42_p9 }
  0x39   : > { %s249_s15 = sshll.u32 %s242_s14, 4  ;;  %s1285_s20 = scalar_lea.hbm %s1440_s1, %s757_s10  ;;  %s1276_s15 = int_to_ptr.vmem [resolvable:$true] %s249_s15 }
  0x3a   : > { %s256_s26 = sand.u32 1, %s1130_s24   ;;  %s239_s11 = scalar_lea.sflag [#allocation3], %s238_s8 }
  0x3b   : > { %s998_s12 = scalar_lea.hbm %s1273_s13, 128  ;;  %p1000_p0 = pneg %p1278_p11 }
  0x3c   : > { %p999_p13 = scmp.ne.s32.totalorder %s1273_s13, %s998_s12  ;;  %s1003_s4 = scalar_lea.hbm %s1439_s0, 256 }
  0x3d   : > { %p1004_p1 = scmp.lt.s32.totalorder %s1273_s13, %s1439_s0  ;;  %p1005_p2 = scmp.lt.s32.totalorder %s1003_s4, %s998_s12 }
  0x3e   : > { %p1001_p5 = pnand %p1000_p0, %p999_p13 }
  0x3f   : > { %p1006_p6 = por %p1005_p2, %p1004_p1 }
  0x40   : > { %p1002_p10 = pneg %p1001_p5 }
  0x42   : > { %p1007_p12 = pnand %p1006_p6, %p1002_p10 }
  0x44   : > { %1010 = shalt.err (!%p1007_p12)
}
  0x45   : > { %s1011_s8 = scalar_lea.vmem %s1276_s15, 128  ;;  %s1136_s2 = smov [#allocation2]  }
  0x46   : > { %p1012_p7 = scmp.ne.s32.totalorder %s1276_s15, %s1011_s8  ;;  %s1016_s10 = sshll.u32 %s1136_s2, 4  ;;  %s1017_s10 = int_to_ptr.vmem [resolvable:$false] %s1016_s10 }
  0x47   : > { %s1018_s18 = scalar_lea.vmem %s1017_s10, 256  ;;  %p1019_p5 = scmp.lt.s32.totalorder %s1276_s15, %s1017_s10 }
  0x48   : > { %p1014_p9 = pnand %p1012_p7, %p1000_p0  ;;  %p1020_p3 = scmp.lt.s32.totalorder %s1018_s18, %s1011_s8 }
  0x4a   : > { %p1015_p13 = pneg %p1014_p9  ;;  %p1021_p4 = por %p1020_p3, %p1019_p5 }
  0x4c   : > { %p1022_p1 = pnand %p1021_p4, %p1015_p13 }
  0x4e   : > { %1025 = shalt.err (!%p1022_p1)
}
  0x4f   : > { %870 = dma.hbm_to_vmem [thread:$0]  (!%p1278_p11), %s1273_s13, 128, %s1276_s15, %s239_s11  }
  0x50   : > { %s260_s4 = scalar_lea.vmem [#allocation5], %s1267_s9  ;;  %s257_s12 = scalar_lea.sflag [#allocation6], %s256_s26 }
  0x51   : > { %s267_s7 = sshll.u32 %s260_s4, 4  ;;  %s1026_s14 = scalar_lea.hbm %s1285_s20, 128  ;;  %s268_s7 = int_to_ptr.vmem [resolvable:$true] %s267_s7 }
  0x52   : > { %p1027_p3 = scmp.ne.s32.totalorder %s1285_s20, %s1026_s14  ;;  %s1031_s2 = scalar_lea.hbm %s1440_s1, 256 }
  0x53   : > { %p1032_p2 = scmp.lt.s32.totalorder %s1285_s20, %s1440_s1  ;;  %p1033_p6 = scmp.lt.s32.totalorder %s1031_s2, %s1026_s14 }
  0x54   : > { %p1029_p4 = pnand %p1027_p3, %p1000_p0 }
  0x55   : > { %p1034_p12 = por %p1033_p6, %p1032_p2 }
  0x56   : > { %p1030_p10 = pneg %p1029_p4 }
  0x58   : > { %p1035_p7 = pnand %p1034_p12, %p1030_p10 }
  0x5a   : > { %1038 = shalt.err (!%p1035_p7)
}
  0x5b   : > { %s1039_s9 = scalar_lea.vmem %s268_s7, 128  ;;  %s1137_s13 = smov [#allocation5]  }
  0x5c   : > { %p1040_p9 = scmp.ne.s32.totalorder %s268_s7, %s1039_s9  ;;  %s1044_s15 = sshll.u32 %s1137_s13, 4  ;;  %s1045_s15 = int_to_ptr.vmem [resolvable:$false] %s1044_s15 }
  0x5d   : > { %s1046_s26 = scalar_lea.vmem %s1045_s15, 256  ;;  %p1047_p1 = scmp.lt.s32.totalorder %s268_s7, %s1045_s15 }
  0x5e   : > { %p1042_p13 = pnand %p1040_p9, %p1000_p0  ;;  %p1048_p3 = scmp.lt.s32.totalorder %s1046_s26, %s1039_s9 }
  0x60   : > { %p1043_p5 = pneg %p1042_p13  ;;  %p1049_p4 = por %p1048_p3, %p1047_p1 }
  0x62   : > { %p1050_p8 = pnand %p1049_p4, %p1043_p5 }
  0x64   : > { %1053 = shalt.err (!%p1050_p8)
}
  0x65   : > { %873 = dma.hbm_to_vmem [thread:$0]  (!%p1278_p11), %s1285_s20, 128, %s268_s7, %s257_s12  }
  0x66   : > { %p1462_p10 = scmp.ne.s32.totalorder %s1454_s29, 0 }
  0x67   : > { %s1336_s11 = sand.u32 (!%p1462_p10), 1, %s1122_s22   ;;  %p1463_p0 = scmp.ne.s32.totalorder (!%p1462_p10), %s1452_s27, 0 }
  0x68   : > { %276 = sbr.rel (%p1462_p10) target bundleno = 634 (0x27a), region = 44  ;;  %s1339_s4 = sshll.u32 (!%p1462_p10), %s1336_s11, 3 }
  0x69   : > { %s279_s14 = scalar_lea.sflag (!%p1462_p10), [#allocation3], %s1336_s11  ;;  %s282_s17 = scalar_lea.vmem (!%p1462_p10), [#allocation2], %s1339_s4 }
  0x6d   : > { %1097 = dma.done.wait (%p1463_p0), %s279_s14, 128  }
  0x6e   : > { %1099 = vsyncadd (%p1463_p0), %s279_s14, 4294967168  ;;  %s287_s29 = sand.u32 1, %s1197_s25   ;;  %s291_s20 = scalar_lea.vmem [#allocation5], %s1339_s4 }
  0x6f   : > { %s288_s16 = scalar_lea.sflag [#allocation6], %s287_s29 }
  0x70   : > { %1101 = dma.done.wait (%p1463_p0), %s288_s16, 128  }
  0x71   : > { %1103 = vsyncadd (%p1463_p0), %s288_s16, 4294967168  ;;  %p1464_p8 = scmp.eq.s32.totalorder %s1197_s25, 0 }
  0x73   : > { %1105 = dma.done.wait (%p1464_p8), [#allocation6], 1024   ;;  %p1465_p11 = pmov %p1464_p8 }
  0x74   : > { %p1466_p2 = pmov %p1464_p8 }
  0x75   : > { %1107 = vsyncadd (%p1465_p11), [#allocation6], 4294966272 }
  0x76   : > { %1109 = dma.done.wait (%p1466_p2), [#allocation9], 1024   ;;  %p1467_p6 = pmov %p1466_p2 }
  0x77   : > { %v1138_v0 = vmov 0.0   ;;  %vm1139_vm0 = vmmov 0   ;;  %v922_v1 = vld [vmem:[#allocation7 + $0x38] sm:$0xff]   ;;  %v923_v2 = vld [vmem:[#allocation7 + $0x30] sm:$0xff]   ;;  %v924_v3 = vld [vmem:[#allocation7 + $0x28] sm:$0xff]   ;;  %s785_s2 = sshll.u32 %s1197_s25, 7 }
  0x78   : > { %1111 = vsyncadd (%p1467_p6), [#allocation9], 4294966272  ;;  %806 = vmatprep.subr.bf16.mxu0 %v1138_v0  ;;  %822 = vmatprep.mubr.msk.bf16.mxu0 %vm1139_vm0, %v1138_v0  ;;  %v925_v4 = vld [vmem:[#allocation7 + $0x20] sm:$0xff]   ;;  %v335_v6 = vld [vmem:[%s291_s20] sm:$0xff]  ;;  %s332_s10 = scalar_lea.vmem [#allocation10], %s1339_s4  ;;  %s1396_s15 = scalar_lea.hbm %s1445_s6, %s785_s2 }
  0x79   : > { %826 = vmatprep.subr.bf16.mxu1 %v1138_v0  ;;  %842 = vmatprep.mubr.msk.bf16.mxu1 %vm1139_vm0, %v1138_v0  ;;  %v1367_v5 = vld [vmem:[%s282_s17] sm:$0xff]  ;;  %v361_v8 = vrot.slane %v335_v6, 4  ;;  %v926_v11 = vld [vmem:[#allocation7 + $0x18] sm:$0xff]   ;;  %v927_v18 = vld [vmem:[#allocation7 + $0x10] sm:$0xff]   ;;  %s639_s18 = sshll.u32 %s332_s10, 4  ;;  %s626_s26 = scalar_lea.sflag [#allocation4], %s1336_s11  ;;  %s1398_s18 = int_to_ptr.vmem [resolvable:$true] %s639_s18 }
  0x7a   : > { %807 = vmatpush3.bf16.msra.mxu0 %v922_v1  ;;  %v336_v7 = vrot.slane %v1367_v5, 4  ;;  %v928_v23 = vld [vmem:[#allocation7 + $0x8] sm:$0xff]   ;;  %v929_v28 = vld [vmem:[#allocation7] sm:$0xff]   ;;  %v930_v61 = vld [vmem:[#allocation8 + $0x38] sm:$0xff]   ;;  %s1054_s14 = scalar_lea.vmem %s1398_s18, 128  ;;  %p1468_p7 = scmp.ne.s32.totalorder %s1459_s30, 0 }
  0x7b   : > { %808 = vmatprep.subr.bf16.mxu0 %v1138_v0  ;;  %v362_v10 = vadd.f32 %v361_v8, %v335_v6  ;;  %827 = vmatpush3.bf16.msra.mxu1 %v930_v61  ;;  %v931_v62 = vld [vmem:[#allocation8 + $0x30] sm:$0xff]   ;;  %v932_v63 = vld [vmem:[#allocation8 + $0x28] sm:$0xff]   ;;  %v933_v1 = vld [vmem:[#allocation8 + $0x20] sm:$0xff]   ;;  %p1055_p12 = scmp.ne.s32.totalorder %s1398_s18, %s1054_s14  ;;  %s1140_s25 = smov [#allocation10]  }
  0x7c   : > { %v337_v9 = vadd.f32 %v336_v7, %v1367_v5  ;;  %828 = vmatprep.subr.bf16.mxu1 %v1138_v0  ;;  %s1058_s4 = sshll.u32 %s1140_s25, 4  ;;  %s1059_s4 = int_to_ptr.vmem [resolvable:$false] %s1058_s4 }
  0x7d   : > { %v363_v13 = vrot.slane %v362_v10, 2  ;;  %p1056_p9 = pnand %p1055_p12, %p1468_p7  ;;  %s1060_s17 = scalar_lea.vmem %s1059_s4, 256 }
  0x7e   : > { %809 = vmatpush3.bf16.msra.mxu0 %v923_v2  ;;  %v338_v12 = vrot.slane %v337_v9, 2  ;;  %v934_v2 = vld [vmem:[#allocation8 + $0x18] sm:$0xff]   ;;  %p1061_p5 = scmp.lt.s32.totalorder %s1398_s18, %s1059_s4  ;;  %p1062_p1 = scmp.lt.s32.totalorder %s1060_s17, %s1054_s14 }
  0x7f   : > { %810 = vmatprep.subr.bf16.mxu0 %v1138_v0  ;;  %v364_v15 = vadd.f32 %v363_v13, %v362_v10  ;;  %829 = vmatpush3.bf16.msra.mxu1 %v931_v62  ;;  %p1057_p13 = pneg %p1056_p9 }
  0x80   : > { %v339_v14 = vadd.f32 %v338_v12, %v337_v9  ;;  %830 = vmatprep.subr.bf16.mxu1 %v1138_v0  ;;  %p1063_p3 = por %p1062_p1, %p1061_p5 }
  0x81   : > { %v365_v17 = vrot.slane %v364_v15, 1 }
  0x82   : > { %811 = vmatpush3.bf16.msra.mxu0 %v924_v3  ;;  %v340_v16 = vrot.slane %v339_v14, 1  ;;  %v935_v3 = vld [vmem:[#allocation8 + $0x10] sm:$0xff]   ;;  %p1064_p4 = pnand %p1063_p3, %p1057_p13 }
  0x83   : > { %812 = vmatprep.subr.bf16.mxu0 %v1138_v0  ;;  %v366_v20 = vadd.f32 %v365_v17, %v364_v15  ;;  %831 = vmatpush3.bf16.msra.mxu1 %v932_v63 }
  0x84   : > { %v341_v19 = vadd.f32 %v340_v16, %v339_v14  ;;  %832 = vmatprep.subr.bf16.mxu1 %v1138_v0 }
  0x85   : > { %v367_v22 = vmul.f32 0.125, %v366_v20 }
  0x86   : > { %813 = vmatpush3.bf16.msra.mxu0 %v925_v4  ;;  %v343_v21 = vmul.f32 0.125, %v341_v19  ;;  %v936_v4 = vld [vmem:[#allocation8 + $0x8] sm:$0xff]  }
  0x87   : > { %814 = vmatprep.subr.bf16.mxu0 %v1138_v0  ;;  %v368_v25 = vsub.f32 %v335_v6, %v367_v22  ;;  %833 = vmatpush3.bf16.msra.mxu1 %v933_v1  ;;  %v766_v6 = vld [vmem:[%s1442_s3] ss:$0 sm:$0xff] }
  0x88   : > { %v344_v24 = vsub.f32 %v1367_v5, %v343_v21  ;;  %834 = vmatprep.subr.bf16.mxu1 %v1138_v0 }
  0x89   : > { %v369_v27 = vmul.f32 %v368_v25, %v368_v25 }
  0x8a   : > { %815 = vmatpush3.bf16.msra.mxu0 %v926_v11  ;;  %v345_v26 = vmul.f32 %v344_v24, %v344_v24 }
  0x8b   : > { %816 = vmatprep.subr.bf16.mxu0 %v1138_v0  ;;  %v370_v30 = vrot.slane %v369_v27, 4  ;;  %835 = vmatpush3.bf16.msra.mxu1 %v934_v2 }
  0x8c   : > { %v346_v29 = vrot.slane %v345_v26, 4  ;;  %836 = vmatprep.subr.bf16.mxu1 %v1138_v0 }
  0x8d   : > { %v371_v32 = vadd.f32 %v370_v30, %v369_v27 }
  0x8e   : > { %817 = vmatpush3.bf16.msra.mxu0 %v927_v18  ;;  %v347_v31 = vadd.f32 %v346_v29, %v345_v26 }
  0x8f   : > { %818 = vmatprep.subr.bf16.mxu0 %v1138_v0  ;;  %v372_v34 = vrot.slane %v371_v32, 2  ;;  %837 = vmatpush3.bf16.msra.mxu1 %v935_v3 }
  0x90   : > { %v348_v33 = vrot.slane %v347_v31, 2  ;;  %838 = vmatprep.subr.bf16.mxu1 %v1138_v0 }
  0x91   : > { %v373_v36 = vadd.f32 %v372_v34, %v371_v32 }
  0x92   : > { %819 = vmatpush3.bf16.msra.mxu0 %v928_v23  ;;  %v349_v35 = vadd.f32 %v348_v33, %v347_v31 }
  0x93   : > { %820 = vmatprep.subr.bf16.mxu0 %v1138_v0  ;;  %v374_v39 = vrot.slane %v373_v36, 1  ;;  %839 = vmatpush3.bf16.msra.mxu1 %v936_v4 }
  0x94   : > { %v350_v37 = vrot.slane %v349_v35, 1  ;;  %840 = vmatprep.subr.bf16.mxu1 %v1138_v0 }
  0x95   : > { %v375_v41 = vadd.f32 %v374_v39, %v373_v36 }
  0x96   : > { %821 = vmatpush3.bf16.msra.mxu0 %v929_v28  ;;  %v351_v38 = vadd.f32 %v350_v37, %v349_v35 }
  0x97   : > { %v376_v42 = vmul.f32 0.14285715, %v375_v41 }
  0x98   : > { %v353_v40 = vmul.f32 0.14285715, %v351_v38 }
  0x99   : > { %vm379_vm3 = vcmp.eq.f32.partialorder %v376_v42, inf  ;;  %v382_v51 = vand.u32 2147483648, %v376_v42  ;;  %vm381_vm4 = vcmp.eq.f32.partialorder %v376_v42, 0.0 }
  0x9a   : > { %938 = vrsqrt.f32 %v353_v40  ;;  %vm356_vm1 = vcmp.eq.f32.partialorder %v353_v40, inf  ;;  %v359_v44 = vand.u32 2147483648, %v353_v40  ;;  %vm358_vm2 = vcmp.eq.f32.partialorder %v353_v40, 0.0 }
  0x9b   : > { %940 = vrsqrt.f32 %v376_v42 }
  0xa7   : > { %v939_v43 = vpop.eup %938 }
  0xa8   : > { %v355_v45 = vmul.f32 %v939_v43, %v353_v40  ;;  %v941_v49 = vpop.eup %940 }
  0xa9   : > { %v378_v50 = vmul.f32 %v941_v49, %v376_v42 }
  0xaa   : > { %v357_v46 = vsel %vm356_vm1, %v353_v40, %v355_v45 }
  0xab   : > { %v360_v47 = vsel %vm358_vm2, %v359_v44, %v357_v46  ;;  %v380_v52 = vsel %vm379_vm3, %v376_v42, %v378_v50 }
  0xac   : > { %v384_v48 = vadd.f32 1e-10, %v360_v47  ;;  %v383_v53 = vsel %vm381_vm4, %v382_v51, %v380_v52 }
  0xae   : > { %942 = vrcp.f32 %v384_v48 }
  0xbb   : > { %v943_v54 = vpop.eup %942 }
  0xbc   : > { %v386_v55 = vmul.f32 %v943_v54, %v383_v53 }
  0xbe   : > { %v387_v56 = vmul.f32 %v386_v55, %v343_v21  ;;  %v389_v57 = vmul.f32 %v386_v55, %v1367_v5  ;;  %v937_v5 = vld [vmem:[#allocation8] sm:$0xff]  }
  0xbf   : > { %841 = vmatpush3.bf16.msra.mxu1 %v937_v5  ;;  %v775_v21 = vld [vmem:[%s1444_s5] ss:$0 sm:$0xff] }
  0xc0   : > { %v388_v58 = vsub.f32 %v367_v22, %v387_v56 }
  0xc2   : > { %v390_v59 = vadd.f32 %v389_v57, %v388_v58 }
  0xc4   : > { %v391_v60 = vpack.c.bf16 %v390_v59, %v390_v59 }
  0xc6   : > { %823 = vmatmul.mubr.bf16.vlgmr.msra.gmra.mxu0 %v391_v60 }
 0x186   : > { %v497_v7 = vpop.f32.mrf.mxu0 }
 0x187   : > { %v498_v8 = vadd.f32 %v766_v6, %v497_v7 }
 0x188   : > { %v824_v9 = vpop.f32.mrf.mxu0 }
 0x189   : > { %v503_v10 = vmul.f32 %v498_v8, %v498_v8 }
 0x18a   : > { %v500_v11 = vpop.f32.mrf.mxu0 }
 0x18b   : > { %v504_v12 = vmul.f32 %v503_v10, %v498_v8 }
 0x18c   : > { %v825_v13 = vpop.f32.mrf.mxu0 }
 0x18d   : > { %v505_v14 = vmul.f32 0.044715, %v504_v12 }
 0x18f   : > { %v506_v15 = vadd.f32 %v505_v14, %v498_v8 }
 0x191   : > { %v507_v16 = vmul.f32 0.7978846, %v506_v15 }
 0x193   : > { %944 = vtanh.f32 %v507_v16 }
 0x1a0   : > { %v945_v17 = vpop.eup %944 }
 0x1a1   : > { %v509_v0 = vadd.f32 1.0, %v945_v17 }
 0x1a3   : > { %v510_v18 = vmul.f32 0.5, %v509_v0 }
 0x1a5   : > { %v511_v19 = vmul.f32 %v510_v18, %v498_v8 }
 0x1a7   : > { %v512_v20 = vpack.c.bf16 %v511_v19, %v511_v19 }
 0x1a9   : > { %843 = vmatmul.mubr.bf16.vlgmr.msra.gmra.mxu1 %v512_v20 }
 0x269   : > { %v618_v22 = vpop.f32.mrf.mxu1 }
 0x26a   : > { %v619_v23 = vadd.f32 %v775_v21, %v618_v22 }
 0x26b   : > { %v844_v24 = vpop.f32.mrf.mxu1 }
 0x26c   : > { %624 = vst [vmem:[%s332_s10] sm:$0xff] %v619_v23 }
 0x26d   : > { %v621_v25 = vpop.f32.mrf.mxu1 }
 0x26e   : > { %1067 = shalt.err (!%p1064_p4)
}
 0x26f   : > { %s1068_s29 = scalar_lea.hbm %s1396_s15, 128  ;;  %s1072_s20 = scalar_lea.hbm %s1445_s6, 256 }
 0x270   : > { %p1069_p10 = scmp.ne.s32.totalorder %s1396_s15, %s1068_s29  ;;  %p1073_p11 = scmp.lt.s32.totalorder %s1396_s15, %s1445_s6 }
 0x271   : > { %p1074_p2 = scmp.lt.s32.totalorder %s1072_s20, %s1068_s29 }
 0x272   : > { %p1070_p0 = pnand %p1069_p10, %p1468_p7 }
 0x273   : > { %p1075_p6 = por %p1074_p2, %p1073_p11 }
 0x274   : > { %p1071_p8 = pneg %p1070_p0 }
 0x276   : > { %p1076_p12 = pnand %p1075_p6, %p1071_p8 }
 0x278   : > { %1079 = shalt.err (!%p1076_p12)
}
 0x279   : > { %858 = dma.vmem_to_hbm [thread:$0]  (%p1468_p7), %s1398_s18, 128, %s1396_s15, %s626_s26   ;;  %v845_v26 = vpop.f32.mrf.mxu1 }
 0x27a PF: > { %s651_s12 = sand.u32 1, %s1118_s21   ;;  %p1469_p9 = scmp.ne.s32.totalorder %s1453_s28, 0 }
 0x27b   : > { %p1470_p13 = scmp.ge.s32.totalorder %s1130_s24, 2  ;;  %s652_s8 = scalar_lea.sflag [#allocation4], %s651_s12 }
 0x27d   : > { %p875_p5 = pnand %p1470_p13, %p1469_p9 }
 0x27f   : > { %p876_p1 = pneg %p875_p5 }
 0x281   : > { %1113 = dma.done.wait (%p876_p1), %s652_s8, 128  }
 0x282   : > { %1115 = vsyncadd (%p876_p1), %s652_s8, 4294967168  ;;  %s1471_s30 = sld [smem:[#allocation16_spill]]  ;;  %p23_p3 = scmp.ge.s32.totalorder %s1248_s19, 4  }
 0x283   : > { %s1472_s21 = smov %s1122_s22  ;;  %s1473_s22 = smov %s1126_s23 }
 0x284   : > { %s1475_s24 = smov %s1248_s19  ;;  %25 = sbr.rel (!%p23_p3) target bundleno = 11 (0xb), region = 110 }
 0x288   : > { %s1474_s23 = smov %s1471_s30 }
 0x289   :  { %657 = vsyncpa [#allocation3], 1 }
 0x28a   :  { %659 = vsyncpa [#allocation3 + $0x1], 1 }
 0x28b   :  { %660 = vsyncpa [#allocation6], 1 }
 0x28c   :  { %662 = vsyncpa [#allocation6 + $0x1], 1 }
 0x28d   :  { %663 = vsyncpa [#allocation9], 1 }
 0x28e   :  { %664 = vsyncpa [#allocation4], 1 }
 0x28f   :  { %666 = vsyncpa [#allocation4 + $0x1], 1 }

</bundles_post_ra>
